<compile_context>
chip_gen: v6e
topology: v6e:2x2x1
jax: 0.10.0
libtpu: 0.0.40
codegen_flags: <defaults>
</compile_context>

<pallas_src>
import functools

import jax
import jax.numpy as jnp
from jax.experimental import pallas as pl
from jax.experimental.pallas import tpu as pltpu


def _embedding_kernel(ids_ref,                       # scalar-prefetch ids (SMEM)
                      segs_ref,                      # (tq, 1) segment ids (VMEM)
                      tok_hbm,                       # token table (HBM)
                      seg_ref,                       # full segment table (VMEM)
                      pos_ref,                       # (tq, D) position rows
                      gamma_ref, beta_ref,           # (1, D) LayerNorm params
                      o_ref,                         # (tq, D) output block
                      tok_buf, sems,                 # scratch: gather buffer + sems
                      *, tq, eps):
    base = pl.program_id(0) * tq

    # 1) Issue every token-row gather DMA before doing anything else so the
    #    copies run concurrently and overlap the VPU work below.
    copies = []
    for t in range(tq):
        row = ids_ref[base + t]
        cp = pltpu.make_async_copy(tok_hbm.at[pl.ds(row, 1)],
                                   tok_buf.at[pl.ds(t, 1)],
                                   sems.at[t])
        cp.start()
        copies.append(cp)

    # 2) Segment embedding from the VMEM-resident (tiny) table via a static
    #    unrolled select-accumulate, summed with the position embedding.
    segs = segs_ref[...]                                   # (tq, 1) int32
    acc = pos_ref[...].astype(jnp.float32)                 # (tq, D)
    for s in range(seg_ref.shape[0]):
        sel = (segs == s).astype(jnp.float32)              # (tq, 1)
        acc = acc + sel * seg_ref[s, :].astype(jnp.float32)

    # 3) Wait for the gathered token rows, finish the embedding sum.
    for cp in copies:
        cp.wait()
    x = acc + tok_buf[...].astype(jnp.float32)             # (tq, D)

    # 4) LayerNorm over the embedding dim (biased variance, like nn.LayerNorm).
    mu = jnp.mean(x, axis=-1, keepdims=True)
    xc = x - mu
    var = jnp.mean(xc * xc, axis=-1, keepdims=True)
    y = xc * jax.lax.rsqrt(var + eps)                      # rsqrt -> EUP slot
    y = y * gamma_ref[0, :] + beta_ref[0, :]

    # TODO(synk): training-mode dropout (p=0.1) not implemented; eval-mode identity.
    o_ref[...] = y.astype(o_ref.dtype)


def embedding_forward(input_ids, segment_ids, tok_table, seg_table, pos_table,
                      gamma, beta, *, tq=8, eps=1e-5):
    """input_ids/segment_ids: (B, T) int.  tok_table: (V, D), seg_table: (S, D),
    pos_table: (>=T, D), gamma/beta: (D,).  Returns (B, T, D)."""
    B, T = input_ids.shape
    V, D = tok_table.shape
    S = seg_table.shape[0]
    N = B * T
    assert T % tq == 0 and tq % 8 == 0, "token tile must be a multiple of 8 and divide T"
    n_tiles = N // tq
    n_pos_blocks = T // tq

    ids_flat = input_ids.reshape(N).astype(jnp.int32)
    segs_2d = segment_ids.reshape(N, 1).astype(jnp.int32)
    pos_used = pos_table[:T]                     # rows actually addressed by arange(T)
    gamma2 = gamma.reshape(1, D)
    beta2 = beta.reshape(1, D)

    if n_pos_blocks == 1:
        pos_index_map = lambda i, ids: (0, 0)
    else:
        pos_index_map = lambda i, ids: (i % n_pos_blocks, 0)

    kernel = functools.partial(_embedding_kernel, tq=tq, eps=eps)

    out = pl.pallas_call(
        kernel,
        out_shape=jax.ShapeDtypeStruct((N, D), tok_table.dtype),
        grid_spec=pltpu.PrefetchScalarGridSpec(
            num_scalar_prefetch=1,
            grid=(n_tiles,),
            in_specs=[
                pl.BlockSpec((tq, 1), lambda i, ids: (i, 0)),       # segment ids
                pl.BlockSpec(memory_space=pl.ANY),                  # token table (HBM)
                pl.BlockSpec((S, D), lambda i, ids: (0, 0)),        # segment table (VMEM-resident)
                pl.BlockSpec((tq, D), pos_index_map),               # position rows
                pl.BlockSpec((1, D), lambda i, ids: (0, 0)),        # gamma
                pl.BlockSpec((1, D), lambda i, ids: (0, 0)),        # beta
            ],
            out_specs=pl.BlockSpec((tq, D), lambda i, ids: (i, 0)),
            scratch_shapes=[
                pltpu.VMEM((tq, D), tok_table.dtype),    # gathered token rows
                pltpu.SemaphoreType.DMA((tq,)),
            ],
        ),
        compiler_params=pltpu.CompilerParams(
            dimension_semantics=("parallel",)),
    )(ids_flat, segs_2d, tok_table, seg_table, pos_used, gamma2, beta2)

    return out.reshape(B, T, D)


def _reference(input_ids, segment_ids, tok, seg, pos, gamma, beta, eps=1e-5):
    """Pure-JAX reference mirroring the PyTorch forward (eval mode)."""
    T = input_ids.shape[1]
    emb = tok[input_ids] + pos[jnp.arange(T)][None, :, :] + seg[segment_ids]
    mu = emb.mean(-1, keepdims=True)
    var = ((emb - mu) ** 2).mean(-1, keepdims=True)
    return (emb - mu) / jnp.sqrt(var + eps) * gamma + beta


if __name__ == "__main__":
    # Small shapes consistent with the module: B=2, seq_len=T=8, embed_dim=32.
    B, T, D = 2, 8, 32
    VOCAB, TYPES = 64, 2

    key = jax.random.PRNGKey(0)
    k_ids, k_seg, k_tok, k_pos, k_stab, k_g, k_b = jax.random.split(key, 7)

    input_ids = jax.random.randint(k_ids, (B, T), 0, VOCAB, dtype=jnp.int32)
    segment_ids = jax.random.randint(k_seg, (B, T), 0, TYPES, dtype=jnp.int32)

    tok_table = jax.random.normal(k_tok, (VOCAB, D), dtype=jnp.float32)
    pos_table = jax.random.normal(k_pos, (T, D), dtype=jnp.float32)
    seg_table = jax.random.normal(k_stab, (TYPES, D), dtype=jnp.float32)
    gamma = 1.0 + 0.1 * jax.random.normal(k_g, (D,), dtype=jnp.float32)
    beta = 0.1 * jax.random.normal(k_b, (D,), dtype=jnp.float32)

    out = embedding_forward(input_ids, segment_ids, tok_table, seg_table,
                            pos_table, gamma, beta, tq=8)
    out = jax.block_until_ready(out)

    ref = _reference(input_ids, segment_ids, tok_table, seg_table, pos_table,
                     gamma, beta)
    assert out.shape == (B, T, D)
    assert jnp.allclose(out, ref, atol=1e-3, rtol=1e-3), "mismatch vs reference"

    print("KERNEL_OK")
</pallas_src>

<mosaic_0001>
module attributes {stable_mosaic.version = 11 : i64} {
  func.func @_embedding_kernel(%arg0: i32, %arg1: memref<16xi32, #tpu.memory_space<smem>>, %arg2: memref<8x1xi32, #tpu.memory_space<vmem>>, %arg3: memref<64x32xf32, #tpu.memory_space<any>>, %arg4: memref<2x32xf32, #tpu.memory_space<vmem>>, %arg5: memref<8x32xf32, #tpu.memory_space<vmem>>, %arg6: memref<1x32xf32, #tpu.memory_space<vmem>>, %arg7: memref<1x32xf32, #tpu.memory_space<vmem>>, %arg8: memref<8x32xf32, #tpu.memory_space<vmem>>, %arg9: memref<8x32xf32, #tpu.memory_space<vmem>>, %arg10: memref<8x!tpu.dma_semaphore, #tpu.memory_space<semaphore_mem>>) attributes {dimension_semantics = [#tpu.dimension_semantics<parallel>], iteration_bounds = array<i64: 2>, scalar_prefetch = 1 : i64, scratch_operands = 2 : i64, tpu.core_type = #tpu.core_type<tc>, window_params = [{transform_indices = @transform_0, window_bounds = array<i64: 8, 1>}, {}, {pipeline_mode = #tpu.pipeline_mode<synchronous>, transform_indices = @transform_2, window_bounds = array<i64: 2, 32>}, {pipeline_mode = #tpu.pipeline_mode<synchronous>, transform_indices = @transform_3, window_bounds = array<i64: 8, 32>}, {pipeline_mode = #tpu.pipeline_mode<synchronous>, transform_indices = @transform_4, window_bounds = array<i64: 1, 32>}, {pipeline_mode = #tpu.pipeline_mode<synchronous>, transform_indices = @transform_5, window_bounds = array<i64: 1, 32>}, {transform_indices = @transform_6, window_bounds = array<i64: 8, 32>}]} {
    %c8_i32 = arith.constant 8 : i32
    %0 = arith.muli %arg0, %c8_i32 : i32
    %c0_i32 = arith.constant 0 : i32
    %1 = arith.addi %0, %c0_i32 : i32
    %2 = arith.index_cast %1 : i32 to index
    %3 = memref.load %arg1[%2] : memref<16xi32, #tpu.memory_space<smem>>
    %c0_i32_0 = arith.constant 0 : i32
    %c0_i32_1 = arith.constant 0 : i32
    %4 = tpu.memref_slice %arg3[%3, %c0_i32_1] : memref<64x32xf32, #tpu.memory_space<any>> -> memref<1x32xf32, #tpu.memory_space<any>>
    %c0_i32_2 = arith.constant 0 : i32
    %c0_i32_3 = arith.constant 0 : i32
    %5 = tpu.memref_slice %arg9[%c0_i32_2, %c0_i32_3] : memref<8x32xf32, #tpu.memory_space<vmem>> -> memref<1x32xf32, #tpu.memory_space<vmem>>
    %6 = tpu.memref_slice %arg10[%c0_i32_0] : memref<8x!tpu.dma_semaphore, #tpu.memory_space<semaphore_mem>> -> memref<1x!tpu.dma_semaphore, #tpu.memory_space<semaphore_mem>>
    %7 = tpu.memref_squeeze %6 : memref<1x!tpu.dma_semaphore, #tpu.memory_space<semaphore_mem>> -> memref<!tpu.dma_semaphore, #tpu.memory_space<semaphore_mem>>
    tpu.enqueue_dma source(%4 : memref<1x32xf32, #tpu.memory_space<any>>) target(%5 : memref<1x32xf32, #tpu.memory_space<vmem>>) target_semaphore(%7 : memref<!tpu.dma_semaphore, #tpu.memory_space<semaphore_mem>>)
    %c1_i32 = arith.constant 1 : i32
    %8 = arith.addi %0, %c1_i32 : i32
    %9 = arith.index_cast %8 : i32 to index
    %10 = memref.load %arg1[%9] : memref<16xi32, #tpu.memory_space<smem>>
    %c1_i32_4 = arith.constant 1 : i32
    %c0_i32_5 = arith.constant 0 : i32
    %11 = tpu.memref_slice %arg3[%10, %c0_i32_5] : memref<64x32xf32, #tpu.memory_space<any>> -> memref<1x32xf32, #tpu.memory_space<any>>
    %c1_i32_6 = arith.constant 1 : i32
    %c0_i32_7 = arith.constant 0 : i32
    %12 = tpu.memref_slice %arg9[%c1_i32_6, %c0_i32_7] : memref<8x32xf32, #tpu.memory_space<vmem>> -> memref<1x32xf32, #tpu.memory_space<vmem>>
    %13 = tpu.memref_slice %arg10[%c1_i32_4] : memref<8x!tpu.dma_semaphore, #tpu.memory_space<semaphore_mem>> -> memref<1x!tpu.dma_semaphore, #tpu.memory_space<semaphore_mem>>
    %14 = tpu.memref_squeeze %13 : memref<1x!tpu.dma_semaphore, #tpu.memory_space<semaphore_mem>> -> memref<!tpu.dma_semaphore, #tpu.memory_space<semaphore_mem>>
    tpu.enqueue_dma source(%11 : memref<1x32xf32, #tpu.memory_space<any>>) target(%12 : memref<1x32xf32, #tpu.memory_space<vmem>>) target_semaphore(%14 : memref<!tpu.dma_semaphore, #tpu.memory_space<semaphore_mem>>)
    %c2_i32 = arith.constant 2 : i32
    %15 = arith.addi %0, %c2_i32 : i32
    %16 = arith.index_cast %15 : i32 to index
    %17 = memref.load %arg1[%16] : memref<16xi32, #tpu.memory_space<smem>>
    %c2_i32_8 = arith.constant 2 : i32
    %c0_i32_9 = arith.constant 0 : i32
    %18 = tpu.memref_slice %arg3[%17, %c0_i32_9] : memref<64x32xf32, #tpu.memory_space<any>> -> memref<1x32xf32, #tpu.memory_space<any>>
    %c2_i32_10 = arith.constant 2 : i32
    %c0_i32_11 = arith.constant 0 : i32
    %19 = tpu.memref_slice %arg9[%c2_i32_10, %c0_i32_11] : memref<8x32xf32, #tpu.memory_space<vmem>> -> memref<1x32xf32, #tpu.memory_space<vmem>>
    %20 = tpu.memref_slice %arg10[%c2_i32_8] : memref<8x!tpu.dma_semaphore, #tpu.memory_space<semaphore_mem>> -> memref<1x!tpu.dma_semaphore, #tpu.memory_space<semaphore_mem>>
    %21 = tpu.memref_squeeze %20 : memref<1x!tpu.dma_semaphore, #tpu.memory_space<semaphore_mem>> -> memref<!tpu.dma_semaphore, #tpu.memory_space<semaphore_mem>>
    tpu.enqueue_dma source(%18 : memref<1x32xf32, #tpu.memory_space<any>>) target(%19 : memref<1x32xf32, #tpu.memory_space<vmem>>) target_semaphore(%21 : memref<!tpu.dma_semaphore, #tpu.memory_space<semaphore_mem>>)
    %c3_i32 = arith.constant 3 : i32
    %22 = arith.addi %0, %c3_i32 : i32
    %23 = arith.index_cast %22 : i32 to index
    %24 = memref.load %arg1[%23] : memref<16xi32, #tpu.memory_space<smem>>
    %c3_i32_12 = arith.constant 3 : i32
    %c0_i32_13 = arith.constant 0 : i32
    %25 = tpu.memref_slice %arg3[%24, %c0_i32_13] : memref<64x32xf32, #tpu.memory_space<any>> -> memref<1x32xf32, #tpu.memory_space<any>>
    %c3_i32_14 = arith.constant 3 : i32
    %c0_i32_15 = arith.constant 0 : i32
    %26 = tpu.memref_slice %arg9[%c3_i32_14, %c0_i32_15] : memref<8x32xf32, #tpu.memory_space<vmem>> -> memref<1x32xf32, #tpu.memory_space<vmem>>
    %27 = tpu.memref_slice %arg10[%c3_i32_12] : memref<8x!tpu.dma_semaphore, #tpu.memory_space<semaphore_mem>> -> memref<1x!tpu.dma_semaphore, #tpu.memory_space<semaphore_mem>>
    %28 = tpu.memref_squeeze %27 : memref<1x!tpu.dma_semaphore, #tpu.memory_space<semaphore_mem>> -> memref<!tpu.dma_semaphore, #tpu.memory_space<semaphore_mem>>
    tpu.enqueue_dma source(%25 : memref<1x32xf32, #tpu.memory_space<any>>) target(%26 : memref<1x32xf32, #tpu.memory_space<vmem>>) target_semaphore(%28 : memref<!tpu.dma_semaphore, #tpu.memory_space<semaphore_mem>>)
    %c4_i32 = arith.constant 4 : i32
    %29 = arith.addi %0, %c4_i32 : i32
    %30 = arith.index_cast %29 : i32 to index
    %31 = memref.load %arg1[%30] : memref<16xi32, #tpu.memory_space<smem>>
    %c4_i32_16 = arith.constant 4 : i32
    %c0_i32_17 = arith.constant 0 : i32
    %32 = tpu.memref_slice %arg3[%31, %c0_i32_17] : memref<64x32xf32, #tpu.memory_space<any>> -> memref<1x32xf32, #tpu.memory_space<any>>
    %c4_i32_18 = arith.constant 4 : i32
    %c0_i32_19 = arith.constant 0 : i32
    %33 = tpu.memref_slice %arg9[%c4_i32_18, %c0_i32_19] : memref<8x32xf32, #tpu.memory_space<vmem>> -> memref<1x32xf32, #tpu.memory_space<vmem>>
    %34 = tpu.memref_slice %arg10[%c4_i32_16] : memref<8x!tpu.dma_semaphore, #tpu.memory_space<semaphore_mem>> -> memref<1x!tpu.dma_semaphore, #tpu.memory_space<semaphore_mem>>
    %35 = tpu.memref_squeeze %34 : memref<1x!tpu.dma_semaphore, #tpu.memory_space<semaphore_mem>> -> memref<!tpu.dma_semaphore, #tpu.memory_space<semaphore_mem>>
    tpu.enqueue_dma source(%32 : memref<1x32xf32, #tpu.memory_space<any>>) target(%33 : memref<1x32xf32, #tpu.memory_space<vmem>>) target_semaphore(%35 : memref<!tpu.dma_semaphore, #tpu.memory_space<semaphore_mem>>)
    %c5_i32 = arith.constant 5 : i32
    %36 = arith.addi %0, %c5_i32 : i32
    %37 = arith.index_cast %36 : i32 to index
    %38 = memref.load %arg1[%37] : memref<16xi32, #tpu.memory_space<smem>>
    %c5_i32_20 = arith.constant 5 : i32
    %c0_i32_21 = arith.constant 0 : i32
    %39 = tpu.memref_slice %arg3[%38, %c0_i32_21] : memref<64x32xf32, #tpu.memory_space<any>> -> memref<1x32xf32, #tpu.memory_space<any>>
    %c5_i32_22 = arith.constant 5 : i32
    %c0_i32_23 = arith.constant 0 : i32
    %40 = tpu.memref_slice %arg9[%c5_i32_22, %c0_i32_23] : memref<8x32xf32, #tpu.memory_space<vmem>> -> memref<1x32xf32, #tpu.memory_space<vmem>>
    %41 = tpu.memref_slice %arg10[%c5_i32_20] : memref<8x!tpu.dma_semaphore, #tpu.memory_space<semaphore_mem>> -> memref<1x!tpu.dma_semaphore, #tpu.memory_space<semaphore_mem>>
    %42 = tpu.memref_squeeze %41 : memref<1x!tpu.dma_semaphore, #tpu.memory_space<semaphore_mem>> -> memref<!tpu.dma_semaphore, #tpu.memory_space<semaphore_mem>>
    tpu.enqueue_dma source(%39 : memref<1x32xf32, #tpu.memory_space<any>>) target(%40 : memref<1x32xf32, #tpu.memory_space<vmem>>) target_semaphore(%42 : memref<!tpu.dma_semaphore, #tpu.memory_space<semaphore_mem>>)
    %c6_i32 = arith.constant 6 : i32
    %43 = arith.addi %0, %c6_i32 : i32
    %44 = arith.index_cast %43 : i32 to index
    %45 = memref.load %arg1[%44] : memref<16xi32, #tpu.memory_space<smem>>
    %c6_i32_24 = arith.constant 6 : i32
    %c0_i32_25 = arith.constant 0 : i32
    %46 = tpu.memref_slice %arg3[%45, %c0_i32_25] : memref<64x32xf32, #tpu.memory_space<any>> -> memref<1x32xf32, #tpu.memory_space<any>>
    %c6_i32_26 = arith.constant 6 : i32
    %c0_i32_27 = arith.constant 0 : i32
    %47 = tpu.memref_slice %arg9[%c6_i32_26, %c0_i32_27] : memref<8x32xf32, #tpu.memory_space<vmem>> -> memref<1x32xf32, #tpu.memory_space<vmem>>
    %48 = tpu.memref_slice %arg10[%c6_i32_24] : memref<8x!tpu.dma_semaphore, #tpu.memory_space<semaphore_mem>> -> memref<1x!tpu.dma_semaphore, #tpu.memory_space<semaphore_mem>>
    %49 = tpu.memref_squeeze %48 : memref<1x!tpu.dma_semaphore, #tpu.memory_space<semaphore_mem>> -> memref<!tpu.dma_semaphore, #tpu.memory_space<semaphore_mem>>
    tpu.enqueue_dma source(%46 : memref<1x32xf32, #tpu.memory_space<any>>) target(%47 : memref<1x32xf32, #tpu.memory_space<vmem>>) target_semaphore(%49 : memref<!tpu.dma_semaphore, #tpu.memory_space<semaphore_mem>>)
    %c7_i32 = arith.constant 7 : i32
    %50 = arith.addi %0, %c7_i32 : i32
    %51 = arith.index_cast %50 : i32 to index
    %52 = memref.load %arg1[%51] : memref<16xi32, #tpu.memory_space<smem>>
    %c7_i32_28 = arith.constant 7 : i32
    %c0_i32_29 = arith.constant 0 : i32
    %53 = tpu.memref_slice %arg3[%52, %c0_i32_29] : memref<64x32xf32, #tpu.memory_space<any>> -> memref<1x32xf32, #tpu.memory_space<any>>
    %c7_i32_30 = arith.constant 7 : i32
    %c0_i32_31 = arith.constant 0 : i32
    %54 = tpu.memref_slice %arg9[%c7_i32_30, %c0_i32_31] : memref<8x32xf32, #tpu.memory_space<vmem>> -> memref<1x32xf32, #tpu.memory_space<vmem>>
    %55 = tpu.memref_slice %arg10[%c7_i32_28] : memref<8x!tpu.dma_semaphore, #tpu.memory_space<semaphore_mem>> -> memref<1x!tpu.dma_semaphore, #tpu.memory_space<semaphore_mem>>
    %56 = tpu.memref_squeeze %55 : memref<1x!tpu.dma_semaphore, #tpu.memory_space<semaphore_mem>> -> memref<!tpu.dma_semaphore, #tpu.memory_space<semaphore_mem>>
    tpu.enqueue_dma source(%53 : memref<1x32xf32, #tpu.memory_space<any>>) target(%54 : memref<1x32xf32, #tpu.memory_space<vmem>>) target_semaphore(%56 : memref<!tpu.dma_semaphore, #tpu.memory_space<semaphore_mem>>)
    %c0 = arith.constant 0 : index
    %c0_32 = arith.constant 0 : index
    %57 = vector.load %arg2[%c0, %c0_32] : memref<8x1xi32, #tpu.memory_space<vmem>>, vector<8x1xi32>
    %c0_33 = arith.constant 0 : index
    %c0_34 = arith.constant 0 : index
    %58 = vector.load %arg5[%c0_33, %c0_34] : memref<8x32xf32, #tpu.memory_space<vmem>>, vector<8x32xf32>
    %c0_i32_35 = arith.constant 0 : i32
    %59 = vector.broadcast %c0_i32_35 : i32 to vector<8x1xi32>
    %60 = arith.cmpi eq, %57, %59 : vector<8x1xi32>
    %61 = arith.extui %60 : vector<8x1xi1> to vector<8x1xi32>
    %62 = arith.sitofp %61 : vector<8x1xi32> to vector<8x1xf32>
    %c0_36 = arith.constant 0 : index
    %c0_37 = arith.constant 0 : index
    %63 = vector.load %arg4[%c0_36, %c0_37] : memref<2x32xf32, #tpu.memory_space<vmem>>, vector<1x32xf32>
    %64 = vector.shape_cast %63 : vector<1x32xf32> to vector<32xf32>
    %65 = vector.shape_cast %64 : vector<32xf32> to vector<1x32xf32>
    %66 = vector.broadcast %62 : vector<8x1xf32> to vector<8x32xf32>
    %67 = vector.broadcast %65 : vector<1x32xf32> to vector<8x32xf32>
    %68 = arith.mulf %66, %67 : vector<8x32xf32>
    %69 = arith.addf %58, %68 : vector<8x32xf32>
    %c1_i32_38 = arith.constant 1 : i32
    %70 = vector.broadcast %c1_i32_38 : i32 to vector<8x1xi32>
    %71 = arith.cmpi eq, %57, %70 : vector<8x1xi32>
    %72 = arith.extui %71 : vector<8x1xi1> to vector<8x1xi32>
    %73 = arith.sitofp %72 : vector<8x1xi32> to vector<8x1xf32>
    %c1 = arith.constant 1 : index
    %c0_39 = arith.constant 0 : index
    %74 = vector.load %arg4[%c1, %c0_39] : memref<2x32xf32, #tpu.memory_space<vmem>>, vector<1x32xf32>
    %75 = vector.shape_cast %74 : vector<1x32xf32> to vector<32xf32>
    %76 = vector.shape_cast %75 : vector<32xf32> to vector<1x32xf32>
    %77 = vector.broadcast %73 : vector<8x1xf32> to vector<8x32xf32>
    %78 = vector.broadcast %76 : vector<1x32xf32> to vector<8x32xf32>
    %79 = arith.mulf %77, %78 : vector<8x32xf32>
    %80 = arith.addf %69, %79 : vector<8x32xf32>
    %c0_i32_40 = arith.constant 0 : i32
    %c0_i32_41 = arith.constant 0 : i32
    %81 = tpu.memref_slice %arg3[%3, %c0_i32_41] : memref<64x32xf32, #tpu.memory_space<any>> -> memref<1x32xf32, #tpu.memory_space<any>>
    %c0_i32_42 = arith.constant 0 : i32
    %c0_i32_43 = arith.constant 0 : i32
    %82 = tpu.memref_slice %arg9[%c0_i32_42, %c0_i32_43] : memref<8x32xf32, #tpu.memory_space<vmem>> -> memref<1x32xf32, #tpu.memory_space<vmem>>
    %83 = tpu.memref_slice %arg10[%c0_i32_40] : memref<8x!tpu.dma_semaphore, #tpu.memory_space<semaphore_mem>> -> memref<1x!tpu.dma_semaphore, #tpu.memory_space<semaphore_mem>>
    %84 = tpu.memref_squeeze %83 : memref<1x!tpu.dma_semaphore, #tpu.memory_space<semaphore_mem>> -> memref<!tpu.dma_semaphore, #tpu.memory_space<semaphore_mem>>
    tpu.wait_dma2 semaphore(%84 : memref<!tpu.dma_semaphore, #tpu.memory_space<semaphore_mem>>) src(%81 : memref<1x32xf32, #tpu.memory_space<any>>) dst(%82 : memref<1x32xf32, #tpu.memory_space<vmem>>)
    %c1_i32_44 = arith.constant 1 : i32
    %c0_i32_45 = arith.constant 0 : i32
    %85 = tpu.memref_slice %arg3[%10, %c0_i32_45] : memref<64x32xf32, #tpu.memory_space<any>> -> memref<1x32xf32, #tpu.memory_space<any>>
    %c1_i32_46 = arith.constant 1 : i32
    %c0_i32_47 = arith.constant 0 : i32
    %86 = tpu.memref_slice %arg9[%c1_i32_46, %c0_i32_47] : memref<8x32xf32, #tpu.memory_space<vmem>> -> memref<1x32xf32, #tpu.memory_space<vmem>>
    %87 = tpu.memref_slice %arg10[%c1_i32_44] : memref<8x!tpu.dma_semaphore, #tpu.memory_space<semaphore_mem>> -> memref<1x!tpu.dma_semaphore, #tpu.memory_space<semaphore_mem>>
    %88 = tpu.memref_squeeze %87 : memref<1x!tpu.dma_semaphore, #tpu.memory_space<semaphore_mem>> -> memref<!tpu.dma_semaphore, #tpu.memory_space<semaphore_mem>>
    tpu.wait_dma2 semaphore(%88 : memref<!tpu.dma_semaphore, #tpu.memory_space<semaphore_mem>>) src(%85 : memref<1x32xf32, #tpu.memory_space<any>>) dst(%86 : memref<1x32xf32, #tpu.memory_space<vmem>>)
    %c2_i32_48 = arith.constant 2 : i32
    %c0_i32_49 = arith.constant 0 : i32
    %89 = tpu.memref_slice %arg3[%17, %c0_i32_49] : memref<64x32xf32, #tpu.memory_space<any>> -> memref<1x32xf32, #tpu.memory_space<any>>
    %c2_i32_50 = arith.constant 2 : i32
    %c0_i32_51 = arith.constant 0 : i32
    %90 = tpu.memref_slice %arg9[%c2_i32_50, %c0_i32_51] : memref<8x32xf32, #tpu.memory_space<vmem>> -> memref<1x32xf32, #tpu.memory_space<vmem>>
    %91 = tpu.memref_slice %arg10[%c2_i32_48] : memref<8x!tpu.dma_semaphore, #tpu.memory_space<semaphore_mem>> -> memref<1x!tpu.dma_semaphore, #tpu.memory_space<semaphore_mem>>
    %92 = tpu.memref_squeeze %91 : memref<1x!tpu.dma_semaphore, #tpu.memory_space<semaphore_mem>> -> memref<!tpu.dma_semaphore, #tpu.memory_space<semaphore_mem>>
    tpu.wait_dma2 semaphore(%92 : memref<!tpu.dma_semaphore, #tpu.memory_space<semaphore_mem>>) src(%89 : memref<1x32xf32, #tpu.memory_space<any>>) dst(%90 : memref<1x32xf32, #tpu.memory_space<vmem>>)
    %c3_i32_52 = arith.constant 3 : i32
    %c0_i32_53 = arith.constant 0 : i32
    %93 = tpu.memref_slice %arg3[%24, %c0_i32_53] : memref<64x32xf32, #tpu.memory_space<any>> -> memref<1x32xf32, #tpu.memory_space<any>>
    %c3_i32_54 = arith.constant 3 : i32
    %c0_i32_55 = arith.constant 0 : i32
    %94 = tpu.memref_slice %arg9[%c3_i32_54, %c0_i32_55] : memref<8x32xf32, #tpu.memory_space<vmem>> -> memref<1x32xf32, #tpu.memory_space<vmem>>
    %95 = tpu.memref_slice %arg10[%c3_i32_52] : memref<8x!tpu.dma_semaphore, #tpu.memory_space<semaphore_mem>> -> memref<1x!tpu.dma_semaphore, #tpu.memory_space<semaphore_mem>>
    %96 = tpu.memref_squeeze %95 : memref<1x!tpu.dma_semaphore, #tpu.memory_space<semaphore_mem>> -> memref<!tpu.dma_semaphore, #tpu.memory_space<semaphore_mem>>
    tpu.wait_dma2 semaphore(%96 : memref<!tpu.dma_semaphore, #tpu.memory_space<semaphore_mem>>) src(%93 : memref<1x32xf32, #tpu.memory_space<any>>) dst(%94 : memref<1x32xf32, #tpu.memory_space<vmem>>)
    %c4_i32_56 = arith.constant 4 : i32
    %c0_i32_57 = arith.constant 0 : i32
    %97 = tpu.memref_slice %arg3[%31, %c0_i32_57] : memref<64x32xf32, #tpu.memory_space<any>> -> memref<1x32xf32, #tpu.memory_space<any>>
    %c4_i32_58 = arith.constant 4 : i32
    %c0_i32_59 = arith.constant 0 : i32
    %98 = tpu.memref_slice %arg9[%c4_i32_58, %c0_i32_59] : memref<8x32xf32, #tpu.memory_space<vmem>> -> memref<1x32xf32, #tpu.memory_space<vmem>>
    %99 = tpu.memref_slice %arg10[%c4_i32_56] : memref<8x!tpu.dma_semaphore, #tpu.memory_space<semaphore_mem>> -> memref<1x!tpu.dma_semaphore, #tpu.memory_space<semaphore_mem>>
    %100 = tpu.memref_squeeze %99 : memref<1x!tpu.dma_semaphore, #tpu.memory_space<semaphore_mem>> -> memref<!tpu.dma_semaphore, #tpu.memory_space<semaphore_mem>>
    tpu.wait_dma2 semaphore(%100 : memref<!tpu.dma_semaphore, #tpu.memory_space<semaphore_mem>>) src(%97 : memref<1x32xf32, #tpu.memory_space<any>>) dst(%98 : memref<1x32xf32, #tpu.memory_space<vmem>>)
    %c5_i32_60 = arith.constant 5 : i32
    %c0_i32_61 = arith.constant 0 : i32
    %101 = tpu.memref_slice %arg3[%38, %c0_i32_61] : memref<64x32xf32, #tpu.memory_space<any>> -> memref<1x32xf32, #tpu.memory_space<any>>
    %c5_i32_62 = arith.constant 5 : i32
    %c0_i32_63 = arith.constant 0 : i32
    %102 = tpu.memref_slice %arg9[%c5_i32_62, %c0_i32_63] : memref<8x32xf32, #tpu.memory_space<vmem>> -> memref<1x32xf32, #tpu.memory_space<vmem>>
    %103 = tpu.memref_slice %arg10[%c5_i32_60] : memref<8x!tpu.dma_semaphore, #tpu.memory_space<semaphore_mem>> -> memref<1x!tpu.dma_semaphore, #tpu.memory_space<semaphore_mem>>
    %104 = tpu.memref_squeeze %103 : memref<1x!tpu.dma_semaphore, #tpu.memory_space<semaphore_mem>> -> memref<!tpu.dma_semaphore, #tpu.memory_space<semaphore_mem>>
    tpu.wait_dma2 semaphore(%104 : memref<!tpu.dma_semaphore, #tpu.memory_space<semaphore_mem>>) src(%101 : memref<1x32xf32, #tpu.memory_space<any>>) dst(%102 : memref<1x32xf32, #tpu.memory_space<vmem>>)
    %c6_i32_64 = arith.constant 6 : i32
    %c0_i32_65 = arith.constant 0 : i32
    %105 = tpu.memref_slice %arg3[%45, %c0_i32_65] : memref<64x32xf32, #tpu.memory_space<any>> -> memref<1x32xf32, #tpu.memory_space<any>>
    %c6_i32_66 = arith.constant 6 : i32
    %c0_i32_67 = arith.constant 0 : i32
    %106 = tpu.memref_slice %arg9[%c6_i32_66, %c0_i32_67] : memref<8x32xf32, #tpu.memory_space<vmem>> -> memref<1x32xf32, #tpu.memory_space<vmem>>
    %107 = tpu.memref_slice %arg10[%c6_i32_64] : memref<8x!tpu.dma_semaphore, #tpu.memory_space<semaphore_mem>> -> memref<1x!tpu.dma_semaphore, #tpu.memory_space<semaphore_mem>>
    %108 = tpu.memref_squeeze %107 : memref<1x!tpu.dma_semaphore, #tpu.memory_space<semaphore_mem>> -> memref<!tpu.dma_semaphore, #tpu.memory_space<semaphore_mem>>
    tpu.wait_dma2 semaphore(%108 : memref<!tpu.dma_semaphore, #tpu.memory_space<semaphore_mem>>) src(%105 : memref<1x32xf32, #tpu.memory_space<any>>) dst(%106 : memref<1x32xf32, #tpu.memory_space<vmem>>)
    %c7_i32_68 = arith.constant 7 : i32
    %c0_i32_69 = arith.constant 0 : i32
    %109 = tpu.memref_slice %arg3[%52, %c0_i32_69] : memref<64x32xf32, #tpu.memory_space<any>> -> memref<1x32xf32, #tpu.memory_space<any>>
    %c7_i32_70 = arith.constant 7 : i32
    %c0_i32_71 = arith.constant 0 : i32
    %110 = tpu.memref_slice %arg9[%c7_i32_70, %c0_i32_71] : memref<8x32xf32, #tpu.memory_space<vmem>> -> memref<1x32xf32, #tpu.memory_space<vmem>>
    %111 = tpu.memref_slice %arg10[%c7_i32_68] : memref<8x!tpu.dma_semaphore, #tpu.memory_space<semaphore_mem>> -> memref<1x!tpu.dma_semaphore, #tpu.memory_space<semaphore_mem>>
    %112 = tpu.memref_squeeze %111 : memref<1x!tpu.dma_semaphore, #tpu.memory_space<semaphore_mem>> -> memref<!tpu.dma_semaphore, #tpu.memory_space<semaphore_mem>>
    tpu.wait_dma2 semaphore(%112 : memref<!tpu.dma_semaphore, #tpu.memory_space<semaphore_mem>>) src(%109 : memref<1x32xf32, #tpu.memory_space<any>>) dst(%110 : memref<1x32xf32, #tpu.memory_space<vmem>>)
    %c0_72 = arith.constant 0 : index
    %c0_73 = arith.constant 0 : index
    %113 = vector.load %arg9[%c0_72, %c0_73] : memref<8x32xf32, #tpu.memory_space<vmem>>, vector<8x32xf32>
    %114 = arith.addf %80, %113 : vector<8x32xf32>
    %cst = arith.constant dense<0.000000e+00> : vector<8xf32>
    %115 = vector.multi_reduction <add>, %114, %cst [1] : vector<8x32xf32> to vector<8xf32>
    %116 = vector.shape_cast %115 : vector<8xf32> to vector<8x1xf32>
    %cst_74 = arith.constant 3.200000e+01 : f32
    %117 = vector.broadcast %cst_74 : f32 to vector<8x1xf32>
    %118 = arith.divf %116, %117 : vector<8x1xf32>
    %119 = vector.broadcast %118 : vector<8x1xf32> to vector<8x32xf32>
    %120 = arith.subf %114, %119 : vector<8x32xf32>
    %121 = arith.mulf %120, %120 : vector<8x32xf32>
    %cst_75 = arith.constant dense<0.000000e+00> : vector<8xf32>
    %122 = vector.multi_reduction <add>, %121, %cst_75 [1] : vector<8x32xf32> to vector<8xf32>
    %123 = vector.shape_cast %122 : vector<8xf32> to vector<8x1xf32>
    %cst_76 = arith.constant 3.200000e+01 : f32
    %124 = vector.broadcast %cst_76 : f32 to vector<8x1xf32>
    %125 = arith.divf %123, %124 : vector<8x1xf32>
    %cst_77 = arith.constant 9.99999974E-6 : f32
    %126 = vector.broadcast %cst_77 : f32 to vector<8x1xf32>
    %127 = arith.addf %125, %126 : vector<8x1xf32>
    %128 = math.rsqrt %127 : vector<8x1xf32>
    %129 = vector.broadcast %128 : vector<8x1xf32> to vector<8x32xf32>
    %130 = arith.mulf %120, %129 : vector<8x32xf32>
    %c0_78 = arith.constant 0 : index
    %c0_79 = arith.constant 0 : index
    %131 = vector.load %arg6[%c0_78, %c0_79] : memref<1x32xf32, #tpu.memory_space<vmem>>, vector<1x32xf32>
    %132 = vector.shape_cast %131 : vector<1x32xf32> to vector<32xf32>
    %133 = vector.shape_cast %132 : vector<32xf32> to vector<1x32xf32>
    %134 = vector.broadcast %133 : vector<1x32xf32> to vector<8x32xf32>
    %135 = arith.mulf %130, %134 : vector<8x32xf32>
    %c0_80 = arith.constant 0 : index
    %c0_81 = arith.constant 0 : index
    %136 = vector.load %arg7[%c0_80, %c0_81] : memref<1x32xf32, #tpu.memory_space<vmem>>, vector<1x32xf32>
    %137 = vector.shape_cast %136 : vector<1x32xf32> to vector<32xf32>
    %138 = vector.shape_cast %137 : vector<32xf32> to vector<1x32xf32>
    %139 = vector.broadcast %138 : vector<1x32xf32> to vector<8x32xf32>
    %140 = arith.addf %135, %139 : vector<8x32xf32>
    %c0_82 = arith.constant 0 : index
    %c0_83 = arith.constant 0 : index
    %141 = vector.load %arg8[%c0_82, %c0_83] : memref<8x32xf32, #tpu.memory_space<vmem>>, vector<8x32xf32>
    tpu.vector_store %arg8[%c0_82, %c0_83], %140 {strides = array<i32>} : memref<8x32xf32, #tpu.memory_space<vmem>>, vector<8x32xf32>,
    return
  }
  func.func @transform_0(%arg0: i32, %arg1: memref<16xi32, #tpu.memory_space<smem>>) -> (i32, i32) {
    %c0_i32 = arith.constant 0 : i32
    %c0_i32_0 = arith.constant 0 : i32
    return %arg0, %c0_i32 : i32, i32
  }
  func.func @transform_2(%arg0: i32, %arg1: memref<16xi32, #tpu.memory_space<smem>>) -> (i32, i32) {
    %c0_i32 = arith.constant 0 : i32
    %c0_i32_0 = arith.constant 0 : i32
    %c0_i32_1 = arith.constant 0 : i32
    return %c0_i32, %c0_i32_0 : i32, i32
  }
  func.func @transform_3(%arg0: i32, %arg1: memref<16xi32, #tpu.memory_space<smem>>) -> (i32, i32) {
    %c0_i32 = arith.constant 0 : i32
    %c0_i32_0 = arith.constant 0 : i32
    %c0_i32_1 = arith.constant 0 : i32
    return %c0_i32, %c0_i32_0 : i32, i32
  }
  func.func @transform_4(%arg0: i32, %arg1: memref<16xi32, #tpu.memory_space<smem>>) -> (i32, i32) {
    %c0_i32 = arith.constant 0 : i32
    %c0_i32_0 = arith.constant 0 : i32
    %c0_i32_1 = arith.constant 0 : i32
    return %c0_i32, %c0_i32_0 : i32, i32
  }
  func.func @transform_5(%arg0: i32, %arg1: memref<16xi32, #tpu.memory_space<smem>>) -> (i32, i32) {
    %c0_i32 = arith.constant 0 : i32
    %c0_i32_0 = arith.constant 0 : i32
    %c0_i32_1 = arith.constant 0 : i32
    return %c0_i32, %c0_i32_0 : i32, i32
  }
  func.func @transform_6(%arg0: i32, %arg1: memref<16xi32, #tpu.memory_space<smem>>) -> (i32, i32) {
    %c0_i32 = arith.constant 0 : i32
    %c0_i32_0 = arith.constant 0 : i32
    return %arg0, %c0_i32 : i32, i32
  }
}

</mosaic_0001>

<bundles_post_ra>
// kernel: tpu_custom_call.1
= control target key start
LH: loop header
LB: loop body
LE: loop exit
PB: predicated region body
PF: predicated region fallthrough
CT: control target
= control target key end

     0   :  { %s1303_s0 = inlined_call_operand.vmem [shape: s32[16], index: 0, kind: input, shape index: {}]   ;;  %s1304_s1 = inlined_call_operand.vmem [shape: s32[16,1], index: 1, kind: input, shape index: {}]   ;;  %s1305_s2 = inlined_call_operand.vmem [shape: f32[64,32], index: 2, kind: input, shape index: {}]   ;;  %s1306_s3 = inlined_call_operand.vmem [shape: f32[2,32], index: 3, kind: input, shape index: {}]   ;;  %s1307_s4 = inlined_call_operand.vmem [shape: f32[8,32], index: 4, kind: input, shape index: {}]   ;;  %s1308_s5 = inlined_call_operand.vmem [shape: f32[1,32], index: 5, kind: input, shape index: {}]   ;;  %s1309_s6 = inlined_call_operand.vmem [shape: f32[1,32], index: 6, kind: input, shape index: {}]   ;;  %s1310_s7 = inlined_call_operand.hbm [shape: f32[16,32], index: 7, kind: output, shape index: {}]  }
   0x1   :  { %s12_s26 = sshll.u32 %s1303_s0, 4  ;;  %s13_s26 = int_to_ptr.vmem [resolvable:$true] %s12_s26 }
   0x2   :  { %s1010_s27 = scalar_lea.vmem %s13_s26, 16  ;;  %p1015_p1 = scmp.lt.s32.totalorder %s13_s26, %s13_s26 }
   0x3   :  { %p1011_p0 = scmp.ne.s32.totalorder %s13_s26, %s1010_s27  ;;  %p1016_p2 = scmp.lt.s32.totalorder %s1010_s27, %s1010_s27 }
   0x5   :  { %p1017_p3 = por %p1016_p2, %p1015_p1 }
   0x7   :  { %p1018_p4 = pnand %p1017_p3, %p1011_p0 }
   0x9   :  { %1021 = shalt.err (!%p1018_p4)  }
   0xa   :  { %s1102_s28 = smov [#allocation5]  }
   0xb   :  { %15 = dma.vmem_to_smem %s13_s26, 16, %s1102_s28, [#allocation4] }
   0xc   :  { %1064 = dma.done.wait [#allocation4], 16 }
   0xd   :  { %1065 = vsyncadd [#allocation4], 4294967280 }
   0xe   :  { %17 = sfence }
   0xf   :  { %18 = vsyncpa [#allocation7], 0 }
  0x10   :  { %20 = vsyncpa [#allocation7 + $0x1], 0  ;;  %s1149_s29 = smov 0   ;;  %s1151_s30 = smov 0  }
  0x11   :  { %s1153_s0 = smov 0   ;;  %s1155_s8 = smov 0  }
  0x12 LB: > { %s1170_s9 = sadd.s32 4294967295, %s1100_s8   ;;  %s940_s10 = sadd.s32 4294967294, %s1100_s8   ;;  %s1100_s8 = sphi %s1155_s8, %s1322_s8   ;;  %s1096_s0 = sphi %s1153_s0, %s1321_s0   ;;  %s1092_s30 = sphi %s1151_s30, %s1320_s30   ;;  %s1088_s29 = sphi %s1149_s29, %s1319_s29  }
  0x13   : > { %s1174_s11 = sadd.s32 1, %s1100_s8   ;;  %s143_s12 = sadd.s32 1, %s1096_s0 }
  0x14   : > { %s140_s13 = ssub.s32 %s1100_s8, %s1174_s11  ;;  %p153_p5 = scmp.ne.s32.totalorder %s1096_s0, %s1092_s30 }
  0x15   : > { %p141_p6 = scmp.eq.s32.totalorder %s140_s13, 0  ;;  %p154_p7 = scmp.eq.s32.totalorder %s1170_s9, 1 }
  0x16   : > { %p159_p8 = scmp.ne.s32.totalorder %s1092_s30, %s1088_s29  ;;  %p160_p9 = scmp.eq.s32.totalorder %s940_s10, 1 }
  0x17   : > { %s1185_s14 = scalar_select %p141_p6, %s1096_s0, %s143_s12  }
  0x18   : > { %p1187_p10 = por %p154_p7, %p153_p5  ;;  %p1191_p11 = por %p160_p9, %p159_p8 }
  0x19   : > { %1312 = sst [smem:[#allocation26_spill]] %s1185_s14  ;;  %p943_p12 = scmp.ge.s32.totalorder %s1100_s8, 1 }
  0x1a   : > { %p197_p13 = scmp.lt.s32.totalorder %s1100_s8, 3 }
  0x1c   : > { %p198_p0 = pnand %p943_p12, %p197_p13 }
  0x1d   : > { %s1311_s17 = sand.u32 (!%p198_p0), 1, %s1092_s30   ;;  %p224_p1 = scmp.lt.s32.totalorder (!%p198_p0), %s1170_s9, 1 }
  0x1e   : > { %201 = sbr.rel (%p198_p0) target bundleno = 583 (0x247), region = 40  ;;  %s1201_s18 = sshll.u32 (!%p198_p0), %s1311_s17, 3 }
  0x1f   : > { %s1204_s19 = sshll.u32 (!%p198_p0), %s1170_s9, 3 }
  0x20   : > { %s229_s20 = sld [smem:[#allocation5 + %s1204_s19]] (!%p198_p0) }
  0x23   : > { %s225_s21 = scalar_select %p224_p1, %s1170_s9, 1 }
  0x25   : > { %s945_s22 = sshll.u32 %s225_s21, 3 }
  0x26   : > { %s1211_s25 = scalar_lea.vmem %s1304_s1, %s945_s22  ;;  %s230_s28 = scalar_lea.vmem %s1305_s2, %s229_s20 }
  0x27   : > { %v249_v0 = vld [vmem:[%s230_s28] sm:$0x1] }
  0x28   : > { %250 = vst [vmem:[#allocation2] sm:$0x1] %v249_v0 }
  0x29   : > { %276 = vsyncadd [#allocation3], 16  ;;  %s277_s12 = sadd.s32 1, %s1204_s19 }
  0x2a   : > { %s278_s13 = sld [smem:[#allocation5 + %s277_s12]] }
  0x30   : > { %s279_s21 = scalar_lea.vmem %s1305_s2, %s278_s13 }
  0x31   : > { %v300_v1 = vld [vmem:[%s279_s21] sm:$0x1] }
  0x32   : > { %301 = vst [vmem:[#allocation2 + $0x1] sm:$0x1] %v300_v1 }
  0x33   : > { %327 = vsyncadd [#allocation3 + $0x1], 16  ;;  %s328_s22 = sadd.s32 2, %s1204_s19 }
  0x34   : > { %s329_s23 = sld [smem:[#allocation5 + %s328_s22]] }
  0x3a   : > { %s330_s20 = scalar_lea.vmem %s1305_s2, %s329_s23 }
  0x3b   : > { %v351_v2 = vld [vmem:[%s330_s20] sm:$0x1] }
  0x3c   : > { %352 = vst [vmem:[#allocation2 + $0x2] sm:$0x1] %v351_v2 }
  0x3d   : > { %378 = vsyncadd [#allocation3 + $0x2], 16  ;;  %s379_s27 = sadd.s32 3, %s1204_s19 }
  0x3e   : > { %s380_s28 = sld [smem:[#allocation5 + %s379_s27]] }
  0x44   : > { %s381_s14 = scalar_lea.vmem %s1305_s2, %s380_s28 }
  0x45   : > { %v402_v3 = vld [vmem:[%s381_s14] sm:$0x1] }
  0x46   : > { %403 = vst [vmem:[#allocation2 + $0x3] sm:$0x1] %v402_v3 }
  0x47   : > { %429 = vsyncadd [#allocation3 + $0x3], 16  ;;  %s430_s17 = sadd.s32 4, %s1204_s19 }
  0x48   : > { %s431_s13 = sld [smem:[#allocation5 + %s430_s17]] }
  0x4e   : > { %s432_s23 = scalar_lea.vmem %s1305_s2, %s431_s13 }
  0x4f   : > { %v453_v4 = vld [vmem:[%s432_s23] sm:$0x1] }
  0x50   : > { %454 = vst [vmem:[#allocation2 + $0x4] sm:$0x1] %v453_v4 }
  0x51   : > { %480 = vsyncadd [#allocation3 + $0x4], 16  ;;  %s481_s24 = sadd.s32 5, %s1204_s19 }
  0x52   : > { %s482_s26 = sld [smem:[#allocation5 + %s481_s24]] }
  0x58   : > { %s483_s10 = scalar_lea.vmem %s1305_s2, %s482_s26 }
  0x59   : > { %v504_v5 = vld [vmem:[%s483_s10] sm:$0x1] }
  0x5a   : > { %505 = vst [vmem:[#allocation2 + $0x5] sm:$0x1] %v504_v5 }
  0x5b   : > { %531 = vsyncadd [#allocation3 + $0x5], 16  ;;  %s532_s28 = sadd.s32 6, %s1204_s19 }
  0x5c   : > { %s533_s12 = sld [smem:[#allocation5 + %s532_s28]] }
  0x62   : > { %s534_s13 = scalar_lea.vmem %s1305_s2, %s533_s12 }
  0x63   : > { %v555_v6 = vld [vmem:[%s534_s13] sm:$0x1] }
  0x64   : > { %556 = vst [vmem:[#allocation2 + $0x6] sm:$0x1] %v555_v6 }
  0x65   : > { %582 = vsyncadd [#allocation3 + $0x6], 16  ;;  %s583_s21 = sadd.s32 7, %s1204_s19  ;;  %v634_v8 = vld [vmem:[%s1211_s25] sm:$0xff]  ;;  %v1103_v9 = vmov 0  }
  0x66   : > { %s584_s22 = sld [smem:[#allocation5 + %s583_s21]]  ;;  %1007 = vset.pattern.permute.xlu0 %v1103_v9  ;;  %vm636_vm0 = vcmp.eq.s32.totalorder %v634_v8, 0  ;;  %vm651_vm1 = vcmp.eq.s32.totalorder %v634_v8, 1 }
  0x6c   : > { %s585_s26 = scalar_lea.vmem %s1305_s2, %s584_s22 }
  0x6d   : > { %v606_v7 = vld [vmem:[%s585_s26] sm:$0x1] }
  0x6e   : > { %607 = vst [vmem:[#allocation2 + $0x7] sm:$0x1] %v606_v7 }
  0x6f   : > { %633 = vsyncadd [#allocation3 + $0x7], 16  ;;  %v1104_v10 = vmov 0.0   ;;  %v948_v13 = vld [vmem:[%s1306_s3] ss:$0 sm:$0xff] }
  0x70   : > { %v947_v11 = vsel %vm636_vm0, 1.0, %v1104_v10  ;;  %v949_v12 = vsel %vm651_vm1, 1.0, %v1104_v10  ;;  %v635_v16 = vld [vmem:[%s1307_s4] sm:$0xff] }
  0x71   : > { %642 = vperm.xlu0 %1007, %v947_v11   ;;  %v950_v17 = vld [vmem:[%s1306_s3 + $0x1] ss:$0 sm:$0xff] }
  0x75   : > { %657 = vperm.xlu0 %1007, %v949_v12  }
  0xec   : > { %v643_v14 = vpop.permute.xlu0 %642 }
  0xed   : > { %v649_v15 = vmul.f32 %v948_v13, %v643_v14 }
  0xef   : > { %v650_v19 = vadd.f32 %v649_v15, %v635_v16 }
  0xf0   : > { %v658_v18 = vpop.permute.xlu0 %657 }
  0xf1   : > { %v664_v20 = vmul.f32 %v950_v17, %v658_v18 }
  0xf3   : > { %v665_v21 = vadd.f32 %v664_v20, %v650_v19 }
  0xf4   : > { %1066 = dma.done.wait [#allocation3], 16 }
  0xf5   : > { %1067 = vsyncadd [#allocation3], 4294967280 }
  0xf6   : > { %1068 = dma.done.wait [#allocation3 + $0x1], 16 }
  0xf7   : > { %1069 = vsyncadd [#allocation3 + $0x1], 4294967280 }
  0xf8   : > { %1070 = dma.done.wait [#allocation3 + $0x2], 16 }
  0xf9   : > { %1071 = vsyncadd [#allocation3 + $0x2], 4294967280 }
  0xfa   : > { %1072 = dma.done.wait [#allocation3 + $0x3], 16 }
  0xfb   : > { %1073 = vsyncadd [#allocation3 + $0x3], 4294967280 }
  0xfc   : > { %1074 = dma.done.wait [#allocation3 + $0x4], 16 }
  0xfd   : > { %1075 = vsyncadd [#allocation3 + $0x4], 4294967280 }
  0xfe   : > { %1076 = dma.done.wait [#allocation3 + $0x5], 16 }
  0xff   : > { %1077 = vsyncadd [#allocation3 + $0x5], 4294967280 }
 0x100   : > { %1078 = dma.done.wait [#allocation3 + $0x6], 16 }
 0x101   : > { %1079 = vsyncadd [#allocation3 + $0x6], 4294967280 }
 0x102   : > { %1080 = dma.done.wait [#allocation3 + $0x7], 16 }
 0x103   : > { %1081 = vsyncadd [#allocation3 + $0x7], 4294967280  ;;  %v683_v22 = vld [vmem:[#allocation2] sm:$0xff]  ;;  %vm685_vm2 = vcmask 261120   ;;  %s954_s21 = sshll.u32 %s1170_s9, 7  ;;  %s1315_s22 = scalar_lea.vmem [#allocation6], %s1201_s18 }
 0x104   : > { %v684_v23 = vadd.f32 %v683_v22, %v665_v21  ;;  %v951_v34 = vld [vmem:[%s1308_s5] ss:$0 sm:$0xff]  ;;  %s731_s23 = sshll.u32 %s1315_s22, 4  ;;  %s729_s20 = scalar_lea.hbm %s1310_s7, %s954_s21  ;;  %s732_s23 = int_to_ptr.vmem [resolvable:$true] %s731_s23 }
 0x105   : > { %v952_v36 = vld [vmem:[%s1309_s6] ss:$0 sm:$0xff]  ;;  %s1316_s19 = smov %s1315_s22  ;;  %s1317_s27 = sand.u32 1, %s1092_s30  }
 0x106   : > { %v686_v24 = vsel %vm685_vm2, %v684_v23, 0.0  ;;  %s718_s10 = scalar_lea.sflag [#allocation7], %s1317_s27  ;;  %s1022_s25 = scalar_lea.vmem %s732_s23, 128 }
 0x107   : > { %687 = vadd.xlane.f32.xlu0 %v686_v24  ;;  %p1023_p2 = scmp.ne.s32.totalorder %s732_s23, %s1022_s25  ;;  %s1105_s9 = smov [#allocation6]  }
 0x108   : > { %s1026_s28 = sshll.u32 %s1105_s9, 4  ;;  %s1027_s28 = int_to_ptr.vmem [resolvable:$false] %s1026_s28 }
 0x109   : > { %p1024_p3 = pnand %p1023_p2, %p1187_p10  ;;  %s1028_s12 = scalar_lea.vmem %s1027_s28, 256 }
 0x10a   : > { %p1029_p5 = scmp.lt.s32.totalorder %s732_s23, %s1027_s28  ;;  %p1030_p6 = scmp.lt.s32.totalorder %s1028_s12, %s1022_s25 }
 0x10b   : > { %p1025_p4 = pneg %p1024_p3 }
 0x10c   : > { %p1031_p7 = por %p1030_p6, %p1029_p5 }
 0x10e   : > { %p1032_p8 = pnand %p1031_p7, %p1025_p4 }
 0x190   : > { %v688_v25 = vpop.xlane.xlu0 %687 }
 0x191   : > { %v690_v26 = vmul.f32 0.03125, %v688_v25 }
 0x193   : > { %v691_v27 = vsub.f32 %v684_v23, %v690_v26 }
 0x195   : > { %v692_v28 = vmul.f32 %v691_v27, %v691_v27 }
 0x197   : > { %v693_v29 = vsel %vm685_vm2, %v692_v28, 0.0 }
 0x198   : > { %694 = vadd.xlane.f32.xlu0 %v693_v29 }
 0x221   : > { %v695_v30 = vpop.xlane.xlu0 %694 }
 0x222   : > { %v696_v31 = vmul.f32 0.03125, %v695_v30 }
 0x224   : > { %v697_v32 = vadd.f32 1e-05, %v696_v31 }
 0x226   : > { %1008 = vrsqrt.f32 %v697_v32 }
 0x233   : > { %v1009_v33 = vpop.eup %1008 }
 0x234   : > { %v699_v35 = vmul.f32 %v1009_v33, %v691_v27 }
 0x236   : > { %v707_v37 = vmul.f32 %v951_v34, %v699_v35 }
 0x238   : > { %v715_v38 = vadd.f32 %v952_v36, %v707_v37 }
 0x23a   : > { %716 = vst.msk [vmem:[%s1316_s19] sm:$0xff] %vm685_vm2, %v715_v38 }
 0x23b   : > { %1035 = shalt.err (!%p1032_p8)
}
 0x23c   : > { %s1036_s14 = scalar_lea.hbm %s729_s20, 128  ;;  %s1040_s13 = scalar_lea.hbm %s1310_s7, 256 }
 0x23d   : > { %p1037_p9 = scmp.ne.s32.totalorder %s729_s20, %s1036_s14  ;;  %p1041_p0 = scmp.lt.s32.totalorder %s729_s20, %s1310_s7 }
 0x23e   : > { %p1042_p1 = scmp.lt.s32.totalorder %s1040_s13, %s1036_s14 }
 0x23f   : > { %p1038_p12 = pnand %p1037_p9, %p1187_p10 }
 0x240   : > { %p1043_p2 = por %p1042_p1, %p1041_p0 }
 0x241   : > { %p1039_p13 = pneg %p1038_p12 }
 0x243   : > { %p1044_p3 = pnand %p1043_p2, %p1039_p13 }
 0x245   : > { %1047 = shalt.err (!%p1044_p3)
}
 0x246   : > { %965 = dma.vmem_to_hbm [thread:$0]  (%p1187_p10), %s732_s23, 128, %s729_s20, %s718_s10  }
 0x247 PF: > { %p971_p4 = scmp.ge.s32.totalorder %s1100_s8, 2  ;;  %s743_s24 = sand.u32 1, %s1088_s29  }
 0x248   : > { %s744_s26 = scalar_lea.sflag [#allocation7], %s743_s24 }
 0x249   : > { %p968_p5 = pnand %p971_p4, %p1191_p11 }
 0x24b   : > { %p969_p6 = pneg %p968_p5 }
 0x24d   : > { %1083 = dma.done.wait (%p969_p6), %s744_s26, 128  }
 0x24e   : > { %1085 = vsyncadd (%p969_p6), %s744_s26, 4294967168  ;;  %s1318_s19 = sld [smem:[#allocation26_spill]]  ;;  %p23_p7 = scmp.ge.s32.totalorder %s1174_s11, 4  }
 0x24f   : > { %s1319_s29 = smov %s1092_s30  ;;  %s1320_s30 = smov %s1096_s0 }
 0x250   : > { %s1322_s8 = smov %s1174_s11  ;;  %25 = sbr.rel (!%p23_p7) target bundleno = 18 (0x12), region = 424 }
 0x254   : > { %s1321_s0 = smov %s1318_s19 }
 0x255   :  { %749 = vsyncpa [#allocation7], 1 }
 0x256   :  { %751 = vsyncpa [#allocation7 + $0x1], 1 }
 0x257   :  { %752 = vsyncmov [#allocation3] }
 0x25a   :  { %s753_s8 = vpop.sfrf %752 }
 0x25b   :  { %p957_p10 = scmp.ne.s32.totalorder %s753_s8, 0 }
 0x25d   :  { %757 = shalt.err (%p957_p10)  }
 0x25e   :  { %759 = vsyncmov [#allocation3 + $0x1] }
 0x261   :  { %s760_s15 = vpop.sfrf %759 }
 0x262   :  { %p958_p11 = scmp.ne.s32.totalorder %s760_s15, 0 }
 0x264   :  { %764 = shalt.err (%p958_p11)  }
 0x265   :  { %766 = vsyncmov [#allocation3 + $0x2] }
 0x268   :  { %s767_s16 = vpop.sfrf %766 }
 0x269   :  { %p959_p8 = scmp.ne.s32.totalorder %s767_s16, 0 }
 0x26b   :  { %771 = shalt.err (%p959_p8)  }
 0x26c   :  { %773 = vsyncmov [#allocation3 + $0x3] }
 0x26f   :  { %s774_s23 = vpop.sfrf %773 }
 0x270   :  { %p960_p9 = scmp.ne.s32.totalorder %s774_s23, 0 }
 0x272   :  { %778 = shalt.err (%p960_p9)  }
 0x273   :  { %780 = vsyncmov [#allocation3 + $0x4] }
 0x276   :  { %s781_s11 = vpop.sfrf %780 }
 0x277   :  { %p961_p12 = scmp.ne.s32.totalorder %s781_s11, 0 }
 0x279   :  { %785 = shalt.err (%p961_p12)  }
 0x27a   :  { %787 = vsyncmov [#allocation3 + $0x5] }
 0x27d   :  { %s788_s1 = vpop.sfrf %787 }
 0x27e   :  { %p962_p13 = scmp.ne.s32.totalorder %s788_s1, 0 }
 0x280   :  { %792 = shalt.err (%p962_p13)  }
 0x281   :  { %794 = vsyncmov [#allocation3 + $0x6] }
 0x284   :  { %s795_s2 = vpop.sfrf %794 }
 0x285   :  { %p963_p0 = scmp.ne.s32.totalorder %s795_s2, 0 }
 0x287   :  { %799 = shalt.err (%p963_p0)  }
 0x288   :  { %801 = vsyncmov [#allocation3 + $0x7] }
 0x28b   :  { %s802_s3 = vpop.sfrf %801 }
 0x28c   :  { %p964_p1 = scmp.ne.s32.totalorder %s802_s3, 0 }
 0x28e   :  { %806 = shalt.err (%p964_p1)  }

</bundles_post_ra>
